<compile_context>
chip_gen: v7x
topology: tpu7x:2x2x1
jax: 0.10.0
libtpu: 0.0.40
codegen_flags: <defaults>
</compile_context>

<pallas_src>
import jax
import jax.numpy as jnp
from jax.experimental import pallas as pl
from jax.experimental.pallas import tpu as pltpu


def _round_up(x: int, m: int) -> int:
    return (x + m - 1) // m * m


def _pick_tile(total: int, max_tile: int, align: int = 128) -> int:
    """Largest multiple of `align` <= max_tile that divides round_up(total, align)."""
    padded = _round_up(total, align)
    best = align
    t = align
    while t <= min(max_tile, padded):
        if padded % t == 0:
            best = t
        t += align
    return best


def _tile_config():
    """Per-generation tile sizes + scoped-VMEM budget."""
    try:
        vmem_bytes = int(pltpu.get_tpu_info().vmem_capacity_bytes)
    except Exception:
        vmem_bytes = 64 * 1024 * 1024  # conservative (v7x-sized) fallback
    if vmem_bytes >= 100 * 1024 * 1024:
        # v5e / v6e: 128 MiB VMEM -> big tiles, generous scoped limit.
        return dict(tm=1024, th=2048, vmem_limit=100 * 1024 * 1024)
    # v7x: 64 MiB VMEM per TC -> ~32 MiB double-buffered working set,
    # never request the full physical VMEM.
    return dict(tm=512, th=1024, vmem_limit=52 * 1024 * 1024)


def mlp_kernel(x_ref, w_in_ref, w_out_ref, o_ref):
    # x_ref:     (TM, Dp)  native dtype (f32 here) -- resident across the H loop
    # w_in_ref:  (Dp, TH)  bf16 (pre-cast, pre-padded)
    # w_out_ref: (TH, Dp)  bf16
    # o_ref:     (TM, Dp)  f32 -- same block across j => resident accumulator
    j = pl.program_id(1)

    # Cast activations to bf16 in-kernel (MXU-native); accumulate in f32.
    x = x_ref[...].astype(jnp.bfloat16)
    h = jnp.dot(x, w_in_ref[...], preferred_element_type=jnp.float32)
    h = jnp.maximum(h, 0.0)
    h = h * h  # relu(x).square()

    contrib = jnp.dot(h.astype(jnp.bfloat16), w_out_ref[...],
                      preferred_element_type=jnp.float32)

    @pl.when(j == 0)
    def _():
        o_ref[...] = contrib          # write, not zero-fill + add

    @pl.when(j != 0)
    def _():
        o_ref[...] += contrib


def prepare_mlp_weights(w_in_t, w_out_t):
    """One-time cast+pad of the weights (hoisted out of the forward call).

    w_in_t:  [D, H]  (in_proj.weight.T)
    w_out_t: [H, D]  (out_proj.weight.T)
    Returns bf16 weights padded so D, H are multiples of 128 (lane-dense).
    """
    D, H = w_in_t.shape
    Dp = _round_up(D, 128)
    Hp = _round_up(H, 128)
    w_in_p = jnp.pad(w_in_t.astype(jnp.bfloat16), ((0, Dp - D), (0, Hp - H)))
    w_out_p = jnp.pad(w_out_t.astype(jnp.bfloat16), ((0, Hp - H), (0, Dp - D)))
    return w_in_p, w_out_p


def mlp_pallas(x, w_in_p, w_out_p, *, tm=None, th=None, vmem_limit=None):
    """x: [B, T, D]; w_in_p: [Dp, Hp] bf16; w_out_p: [Hp, Dp] bf16 (pre-padded)."""
    cfg = _tile_config()
    tm = tm or cfg["tm"]
    th = th or cfg["th"]
    vmem_limit = vmem_limit or cfg["vmem_limit"]

    B, T, D = x.shape
    M = B * T
    Dp, Hp = w_in_p.shape
    assert w_out_p.shape == (Hp, Dp)

    # M tile: multiple of 16 (bf16 row packing), clamped to the problem.
    TM = min(tm, _round_up(M, 16))
    Mp = _round_up(M, TM)
    # H tile: a divisor of Hp (no wasted reduction tiles).
    TH = _pick_tile(Hp, th)

    # x stays in its native dtype; kernel casts to bf16.  In the production
    # case (D % 128 == 0, M % TM == 0) this is a zero-copy reshape.
    x2d = x.reshape(M, D)
    if Mp != M or Dp != D:
        x2d = jnp.pad(x2d, ((0, Mp - M), (0, Dp - D)))

    grid = (Mp // TM, Hp // TH)

    cost = pl.CostEstimate(
        flops=4 * Mp * Dp * Hp,               # 2*M*D*H per matmul, two matmuls
        transcendentals=0,
        bytes_accessed=(x2d.size * x2d.dtype.itemsize
                        # weights are re-streamed once per M tile:
                        + grid[0] * (w_in_p.size + w_out_p.size) * 2
                        + Mp * Dp * 4),        # f32 output write
    )

    out2d = pl.pallas_call(
        mlp_kernel,
        out_shape=jax.ShapeDtypeStruct((Mp, Dp), jnp.float32),
        grid_spec=pltpu.PrefetchScalarGridSpec(
            num_scalar_prefetch=0,
            grid=grid,
            in_specs=[
                pl.BlockSpec((TM, Dp), lambda i, j: (i, 0)),   # x tile
                pl.BlockSpec((Dp, TH), lambda i, j: (0, j)),   # in_proj slab
                pl.BlockSpec((TH, Dp), lambda i, j: (j, 0)),   # out_proj slab
            ],
            out_specs=pl.BlockSpec((TM, Dp), lambda i, j: (i, 0)),
        ),
        compiler_params=pltpu.CompilerParams(
            dimension_semantics=("parallel", "arbitrary"),
            vmem_limit_bytes=vmem_limit,
        ),
        cost_estimate=cost,
    )(x2d, w_in_p, w_out_p)

    return out2d[:M, :D].reshape(B, T, D).astype(x.dtype)


def init_params(key, model_dim, intermediate_dim):
    # CastedLinear init: uniform(-bound, bound), bound = sqrt(3)*0.5*in^-0.5.
    # PyTorch weight shape is (out, in); we store the transpose (in, out).
    # NOTE: the module's out_proj is zero-initialized (zero_init=True).
    bound = (3.0 ** 0.5) * 0.5 * (model_dim ** -0.5)
    w_in = jax.random.uniform(
        key, (intermediate_dim, model_dim), minval=-bound, maxval=bound,
        dtype=jnp.float32)
    w_in_t = w_in.T                                                   # (D, H)
    w_out_t = jnp.zeros((intermediate_dim, model_dim), jnp.float32)   # (H, D)
    return w_in_t, w_out_t


if __name__ == "__main__":
    # Small config consistent with the module: model_dim=32 -> intermediate=128
    B, T, D = 2, 8, 32
    H = 4 * D

    key = jax.random.PRNGKey(0)
    k_x, k_win, k_wout = jax.random.split(key, 3)
    x = jax.random.normal(k_x, (B, T, D), dtype=jnp.float32)

    w_in_t, w_out_zero = init_params(k_win, D, H)

    # The module's out_proj is zero-init, which makes a correctness check
    # vacuous (output is identically zero). Verify numerics with a nonzero
    # out_proj, then also run the true zero-init path.
    bound_out = (3.0 ** 0.5) * 0.5 * (H ** -0.5)
    w_out_t = jax.random.uniform(
        k_wout, (H, D), minval=-bound_out, maxval=bound_out, dtype=jnp.float32)

    # One-time weight prep (hoisted cast+pad).
    w_in_p, w_out_p = prepare_mlp_weights(w_in_t, w_out_t)
    w_in_p_zero, w_out_p_zero = prepare_mlp_weights(w_in_t, w_out_zero)

    out = mlp_pallas(x, w_in_p, w_out_p)
    jax.block_until_ready(out)

    # Reference mirroring the kernel's bf16 / f32-accumulate math.
    # NOTE: relu(x)^2 is cast to bf16 before the second matmul (flagged for
    # training-quality comparisons; the reference mirrors it).
    xb = x.reshape(-1, D).astype(jnp.bfloat16).astype(jnp.float32)
    wib = w_in_t.astype(jnp.bfloat16).astype(jnp.float32)
    wob = w_out_t.astype(jnp.bfloat16).astype(jnp.float32)
    h_ref = jnp.maximum(xb @ wib, 0.0) ** 2
    ref = (h_ref.astype(jnp.bfloat16).astype(jnp.float32) @ wob).reshape(B, T, D)
    assert jnp.allclose(out, ref, atol=2e-2, rtol=2e-2), "mismatch vs reference"

    # Zero-init out_proj path (module default): output must be exactly zero.
    out_zero = mlp_pallas(x, w_in_p_zero, w_out_p_zero)
    jax.block_until_ready(out_zero)
    assert jnp.allclose(out_zero, jnp.zeros_like(out_zero)), "zero-init path wrong"

    print("KERNEL_OK")
</pallas_src>

<mosaic_0001>
module attributes {stable_mosaic.version = 11 : i64} {
  func.func @mlp_kernel(%arg0: i32, %arg1: i32, %arg2: memref<16x128xf32, #tpu.memory_space<vmem>>, %arg3: memref<128x128xbf16, #tpu.memory_space<vmem>>, %arg4: memref<128x128xbf16, #tpu.memory_space<vmem>>, %arg5: memref<16x128xf32, #tpu.memory_space<vmem>>) attributes {dimension_semantics = [#tpu.dimension_semantics<parallel>, #tpu.dimension_semantics<arbitrary>], iteration_bounds = array<i64: 1, 1>, scalar_prefetch = 0 : i64, scratch_operands = 0 : i64, tpu.core_type = #tpu.core_type<tc>, window_params = [{transform_indices = @transform_0, window_bounds = array<i64: 16, 128>}, {transform_indices = @transform_1, window_bounds = array<i64: 128, 128>}, {transform_indices = @transform_2, window_bounds = array<i64: 128, 128>}, {transform_indices = @transform_3, window_bounds = array<i64: 16, 128>}]} {
    %c0 = arith.constant 0 : index
    %c0_0 = arith.constant 0 : index
    %0 = vector.load %arg2[%c0, %c0_0] : memref<16x128xf32, #tpu.memory_space<vmem>>, vector<16x128xf32>
    %1 = arith.truncf %0 : vector<16x128xf32> to vector<16x128xbf16>
    %c0_1 = arith.constant 0 : index
    %c0_2 = arith.constant 0 : index
    %2 = vector.load %arg3[%c0_1, %c0_2] : memref<128x128xbf16, #tpu.memory_space<vmem>>, vector<128x128xbf16>
    %cst = arith.constant dense<0.000000e+00> : vector<16x128xf32>
    %3 = tpu.matmul %1, %2, %cst {dimension_numbers = #tpu.dot_dimension_numbers<[1], [0], [0], [1], [0, 0, 1, 1], [], []>} : vector<16x128xbf16>, vector<128x128xbf16>, vector<16x128xf32> -> vector<16x128xf32>
    %cst_3 = arith.constant 0.000000e+00 : f32
    %4 = vector.broadcast %cst_3 : f32 to vector<16x128xf32>
    %5 = arith.maximumf %3, %4 : vector<16x128xf32>
    %6 = arith.mulf %5, %5 : vector<16x128xf32>
    %7 = arith.truncf %6 : vector<16x128xf32> to vector<16x128xbf16>
    %c0_4 = arith.constant 0 : index
    %c0_5 = arith.constant 0 : index
    %8 = vector.load %arg4[%c0_4, %c0_5] : memref<128x128xbf16, #tpu.memory_space<vmem>>, vector<128x128xbf16>
    %cst_6 = arith.constant dense<0.000000e+00> : vector<16x128xf32>
    %9 = tpu.matmul %7, %8, %cst_6 {dimension_numbers = #tpu.dot_dimension_numbers<[1], [0], [0], [1], [0, 0, 1, 1], [], []>} : vector<16x128xbf16>, vector<128x128xbf16>, vector<16x128xf32> -> vector<16x128xf32>
    %c0_i32 = arith.constant 0 : i32
    %10 = arith.cmpi eq, %arg1, %c0_i32 : i32
    %11 = arith.extui %10 : i1 to i32
    %c0_i32_7 = arith.constant 0 : i32
    %12 = arith.cmpi ne, %11, %c0_i32_7 : i32
    scf.if %12 {
      %c0_10 = arith.constant 0 : index
      %c0_11 = arith.constant 0 : index
      %16 = vector.load %arg5[%c0_10, %c0_11] : memref<16x128xf32, #tpu.memory_space<vmem>>, vector<16x128xf32>
      tpu.vector_store %arg5[%c0_10, %c0_11], %9 {strides = array<i32>} : memref<16x128xf32, #tpu.memory_space<vmem>>, vector<16x128xf32>,
    } else {
    }
    %c0_i32_8 = arith.constant 0 : i32
    %13 = arith.cmpi ne, %arg1, %c0_i32_8 : i32
    %14 = arith.extui %13 : i1 to i32
    %c0_i32_9 = arith.constant 0 : i32
    %15 = arith.cmpi ne, %14, %c0_i32_9 : i32
    scf.if %15 {
      %c0_10 = arith.constant 0 : index
      %c0_11 = arith.constant 0 : index
      %16 = vector.load %arg5[%c0_10, %c0_11] : memref<16x128xf32, #tpu.memory_space<vmem>>, vector<16x128xf32>
      %17 = arith.addf %16, %9 : vector<16x128xf32>
      %c0_12 = arith.constant 0 : index
      %c0_13 = arith.constant 0 : index
      %18 = vector.load %arg5[%c0_12, %c0_13] : memref<16x128xf32, #tpu.memory_space<vmem>>, vector<16x128xf32>
      tpu.vector_store %arg5[%c0_12, %c0_13], %17 {strides = array<i32>} : memref<16x128xf32, #tpu.memory_space<vmem>>, vector<16x128xf32>,
    } else {
    }
    return
  }
  func.func @transform_0(%arg0: i32, %arg1: i32) -> (i32, i32) {
    %c0_i32 = arith.constant 0 : i32
    %c0_i32_0 = arith.constant 0 : i32
    return %arg0, %c0_i32 : i32, i32
  }
  func.func @transform_1(%arg0: i32, %arg1: i32) -> (i32, i32) {
    %c0_i32 = arith.constant 0 : i32
    %c0_i32_0 = arith.constant 0 : i32
    return %c0_i32, %arg1 : i32, i32
  }
  func.func @transform_2(%arg0: i32, %arg1: i32) -> (i32, i32) {
    %c0_i32 = arith.constant 0 : i32
    %c0_i32_0 = arith.constant 0 : i32
    return %arg1, %c0_i32 : i32, i32
  }
  func.func @transform_3(%arg0: i32, %arg1: i32) -> (i32, i32) {
    %c0_i32 = arith.constant 0 : i32
    %c0_i32_0 = arith.constant 0 : i32
    return %arg0, %c0_i32 : i32, i32
  }
}

</mosaic_0001>

<bundles_post_ra>
// kernel: tpu_custom_call.1
= control target key start
LH: loop header
LB: loop body
LE: loop exit
PB: predicated region body
PF: predicated region fallthrough
CT: control target
= control target key end

     0   :  { %8 = vsyncpa [#allocation3], 0  ;;  %s593_s0 = inlined_call_operand.hbm [shape: f32[16,128], index: 0, kind: input, shape index: {}]   ;;  %s594_s1 = inlined_call_operand.hbm [shape: bf16[128,128], index: 1, kind: input, shape index: {}]   ;;  %s595_s2 = inlined_call_operand.hbm [shape: bf16[128,128], index: 2, kind: input, shape index: {}]   ;;  %s596_s3 = inlined_call_operand.hbm [shape: f32[16,128], index: 3, kind: output, shape index: {}]  }
   0x1   :  { %9 = vsyncpa [#allocation6], 0 }
   0x2   :  { %10 = vsyncpa [#allocation4], 0  ;;  %s503_s12 = smov [#allocation5]   ;;  %s409_s16 = scalar_lea.hbm %s594_s1, 1024 }
   0x3   :  { %s28_s13 = sshll.u32 %s503_s12, 4  ;;  %p410_p0 = scmp.ne.s32.totalorder %s594_s1, %s409_s16  ;;  %s29_s13 = int_to_ptr.vmem [resolvable:$true] %s28_s13 }
   0x4   :  { %p413_p1 = scmp.lt.u32.totalorder %s409_s16, %s594_s1 }
   0x6   :  { %p415_p2 = pnand %p413_p1, %p410_p0 }
   0x8   :  { %418 = shalt.err (!%p415_p2)
}
   0x9   :  { %s419_s21 = scalar_lea.vmem %s29_s13, 1024  ;;  %p424_p4 = scmp.lt.s32.totalorder %s29_s13, %s29_s13 }
   0xa   :  { %p420_p3 = scmp.ne.s32.totalorder %s29_s13, %s419_s21  ;;  %p425_p5 = scmp.lt.s32.totalorder %s419_s21, %s419_s21 }
   0xc   :  { %p426_p6 = por %p425_p5, %p424_p4 }
   0xe   :  { %p427_p7 = pnand %p426_p6, %p420_p3 }
  0x10   :  { %430 = shalt.err (!%p427_p7)
}
  0x11   :  { %s504_s22 = smov 64   ;;  %s505_s23 = smov 4  }
  0x12   :  { %34 = dma.hbm_to_vmem [thread:$0]  %s594_s1, 1024, %s29_s13, [#allocation6], %s504_s22, %s504_s22, %s505_s23  }
  0x13   :  { %s506_s26 = smov [#allocation2]   ;;  %s431_s30 = scalar_lea.hbm %s593_s0, 256 }
  0x14   :  { %s16_s27 = sshll.u32 %s506_s26, 4  ;;  %p432_p8 = scmp.ne.s32.totalorder %s593_s0, %s431_s30  ;;  %s17_s27 = int_to_ptr.vmem [resolvable:$true] %s16_s27 }
  0x15   :  { %p435_p9 = scmp.lt.u32.totalorder %s431_s30, %s593_s0 }
  0x17   :  { %p437_p10 = pnand %p435_p9, %p432_p8 }
  0x19   :  { %440 = shalt.err (!%p437_p10)
}
  0x1a   :  { %s441_s8 = scalar_lea.vmem %s17_s27, 256  ;;  %p446_p12 = scmp.lt.s32.totalorder %s17_s27, %s17_s27 }
  0x1b   :  { %p442_p11 = scmp.ne.s32.totalorder %s17_s27, %s441_s8  ;;  %p447_p13 = scmp.lt.s32.totalorder %s441_s8, %s441_s8 }
  0x1d   :  { %p448_p0 = por %p447_p13, %p446_p12 }
  0x1f   :  { %p449_p1 = pnand %p448_p0, %p442_p11 }
  0x21   :  { %452 = shalt.err (!%p449_p1)
}
  0x22   :  { %s507_s1 = smov 128   ;;  %s508_s9 = smov 8  }
  0x23   :  { %22 = dma.hbm_to_vmem [thread:$0]  %s593_s0, 256, %s17_s27, [#allocation3], %s507_s1, %s507_s1, %s508_s9  }
  0x24   :  { %s509_s12 = smov [#allocation7]   ;;  %s453_s16 = scalar_lea.hbm %s595_s2, 1024 }
  0x25   :  { %s40_s13 = sshll.u32 %s509_s12, 4  ;;  %p454_p2 = scmp.ne.s32.totalorder %s595_s2, %s453_s16  ;;  %s41_s13 = int_to_ptr.vmem [resolvable:$true] %s40_s13 }
  0x26   :  { %p457_p3 = scmp.lt.u32.totalorder %s453_s16, %s595_s2 }
  0x28   :  { %p459_p4 = pnand %p457_p3, %p454_p2 }
  0x2a   :  { %462 = shalt.err (!%p459_p4)
}
  0x2b   :  { %s463_s21 = scalar_lea.vmem %s41_s13, 1024  ;;  %p468_p6 = scmp.lt.s32.totalorder %s41_s13, %s41_s13 }
  0x2c   :  { %p464_p5 = scmp.ne.s32.totalorder %s41_s13, %s463_s21  ;;  %p469_p7 = scmp.lt.s32.totalorder %s463_s21, %s463_s21 }
  0x2e   :  { %p470_p8 = por %p469_p7, %p468_p6 }
  0x30   :  { %p471_p9 = pnand %p470_p8, %p464_p5 }
  0x32   :  { %474 = shalt.err (!%p471_p9)
}
  0x33   :  { %46 = dma.hbm_to_vmem [thread:$0]  %s595_s2, 1024, %s41_s13, [#allocation6], %s504_s22, %s504_s22, %s505_s23  }
  0x34   :  { %497 = dma.done.wait [#allocation3], 256  }
  0x35   :  { %498 = vsyncadd [#allocation3], 4294967040 }
  0x36   :  { %499 = dma.done.wait [#allocation6], 2048  }
  0x37   :  { %500 = vsyncadd [#allocation6], 4294965248  ;;  %v510_v0 = vmov 0.0   ;;  %vm511_vm0 = vmmov 0   ;;  %v393_v1 = vld [vmem:[#allocation5] sm:$0xff]   ;;  %v394_v2 = vld [vmem:[#allocation5 + $0x8] sm:$0xff]  }
  0x38   :  { %343 = vmatprep.subr.bf16.mxu0 %v510_v0  ;;  %359 = vmatprep.mubr.msk.bf16.mxu0 %vm511_vm0, %v510_v0  ;;  %v395_v3 = vld [vmem:[#allocation5 + $0x10] sm:$0xff]   ;;  %v401_v4 = vld [vmem:[#allocation7] sm:$0xff]   ;;  %v396_v5 = vld [vmem:[#allocation5 + $0x18] sm:$0xff]   ;;  %s512_s2 = smov [#allocation8]  }
  0x39   :  { %363 = vmatprep.subr.bf16.mxu1 %v510_v0  ;;  %379 = vmatprep.mubr.msk.bf16.mxu1 %vm511_vm0, %v510_v0  ;;  %v402_v6 = vld [vmem:[#allocation7 + $0x8] sm:$0xff]   ;;  %v397_v7 = vld [vmem:[#allocation5 + $0x20] sm:$0xff]   ;;  %v403_v8 = vld [vmem:[#allocation7 + $0x10] sm:$0xff]   ;;  %s296_s22 = sshll.u32 %s512_s2, 4  ;;  %s297_s22 = int_to_ptr.vmem [resolvable:$true] %s296_s22 }
  0x3a   :  { %344 = vmatpush3.bf16.msra.mxu0 %v393_v1  ;;  %364 = vmatpush3.bf16.msra.mxu1 %v401_v4  ;;  %v398_v9 = vld [vmem:[#allocation5 + $0x28] sm:$0xff]   ;;  %v404_v10 = vld [vmem:[#allocation7 + $0x18] sm:$0xff]   ;;  %v399_v11 = vld [vmem:[#allocation5 + $0x30] sm:$0xff]   ;;  %s475_s23 = scalar_lea.vmem %s297_s22, 256  ;;  %p480_p11 = scmp.lt.s32.totalorder %s297_s22, %s297_s22 }
  0x3b   :  { %345 = vmatprep.subr.bf16.mxu0 %v510_v0  ;;  %365 = vmatprep.subr.bf16.mxu1 %v510_v0  ;;  %v405_v12 = vld [vmem:[#allocation7 + $0x20] sm:$0xff]   ;;  %v400_v13 = vld [vmem:[#allocation5 + $0x38] sm:$0xff]   ;;  %v57_v14 = vld [vmem:[#allocation2] sm:$0xff]  ;;  %p476_p10 = scmp.ne.s32.totalorder %s297_s22, %s475_s23  ;;  %p481_p12 = scmp.lt.s32.totalorder %s475_s23, %s475_s23 }
  0x3c   :  { %v58_v15 = vld [vmem:[#allocation2 + $0x8] sm:$0xff]  ;;  %v406_v16 = vld [vmem:[#allocation7 + $0x28] sm:$0xff]   ;;  %v407_v18 = vld [vmem:[#allocation7 + $0x30] sm:$0xff]  }
  0x3d   :  { %v59_v17 = vpack.c.bf16 %v58_v15, %v57_v14  ;;  %v408_v19 = vld [vmem:[#allocation7 + $0x38] sm:$0xff]   ;;  %p482_p13 = por %p481_p12, %p480_p11 }
  0x3e   :  { %346 = vmatpush3.bf16.msra.mxu0 %v394_v2  ;;  %366 = vmatpush3.bf16.msra.mxu1 %v402_v6 }
  0x3f   :  { %347 = vmatprep.subr.bf16.mxu0 %v510_v0  ;;  %367 = vmatprep.subr.bf16.mxu1 %v510_v0  ;;  %p483_p0 = pnand %p482_p13, %p476_p10 }
  0x42   :  { %348 = vmatpush3.bf16.msra.mxu0 %v395_v3  ;;  %368 = vmatpush3.bf16.msra.mxu1 %v403_v8 }
  0x43   :  { %349 = vmatprep.subr.bf16.mxu0 %v510_v0  ;;  %369 = vmatprep.subr.bf16.mxu1 %v510_v0 }
  0x46   :  { %350 = vmatpush3.bf16.msra.mxu0 %v396_v5  ;;  %370 = vmatpush3.bf16.msra.mxu1 %v404_v10 }
  0x47   :  { %351 = vmatprep.subr.bf16.mxu0 %v510_v0  ;;  %371 = vmatprep.subr.bf16.mxu1 %v510_v0 }
  0x4a   :  { %352 = vmatpush3.bf16.msra.mxu0 %v397_v7  ;;  %372 = vmatpush3.bf16.msra.mxu1 %v405_v12 }
  0x4b   :  { %353 = vmatprep.subr.bf16.mxu0 %v510_v0  ;;  %373 = vmatprep.subr.bf16.mxu1 %v510_v0 }
  0x4e   :  { %354 = vmatpush3.bf16.msra.mxu0 %v398_v9  ;;  %374 = vmatpush3.bf16.msra.mxu1 %v406_v16 }
  0x4f   :  { %355 = vmatprep.subr.bf16.mxu0 %v510_v0  ;;  %375 = vmatprep.subr.bf16.mxu1 %v510_v0 }
  0x52   :  { %356 = vmatpush3.bf16.msra.mxu0 %v399_v11  ;;  %376 = vmatpush3.bf16.msra.mxu1 %v407_v18 }
  0x53   :  { %357 = vmatprep.subr.bf16.mxu0 %v510_v0  ;;  %377 = vmatprep.subr.bf16.mxu1 %v510_v0 }
  0x56   :  { %358 = vmatpush3.bf16.msra.mxu0 %v400_v13  ;;  %378 = vmatpush3.bf16.msra.mxu1 %v408_v19 }
  0x59   :  { %360 = vmatmul.mubr.bf16.vlgmr.msra.gmra.mrb[0].mxu0 %v59_v17 }
 0x12c   :  { %v158_v20 = vpop.f32.mrb[0].mxu0 }
 0x12d   :  { %v165_v21 = vmax.f32 %v158_v20, 0.0  ;;  %v361_v22 = vpop.f32.mrb[1].mxu0 }
 0x12e   :  { %v161_v23 = vpop.f32.mrb[2].mxu0 }
 0x12f   :  { %v166_v24 = vmax.f32 %v161_v23, 0.0  ;;  %v362_v25 = vpop.f32.mrb[3].mxu0  ;;  %v167_v26 = vmul.f32 %v165_v21, %v165_v21 }
 0x131   :  { %v168_v27 = vmul.f32 %v166_v24, %v166_v24 }
 0x133   :  { %v169_v28 = vpack.c.bf16 %v168_v27, %v167_v26 }
 0x135   :  { %380 = vmatmul.mubr.bf16.vlgmr.msra.gmra.mrb[0].mxu1 %v169_v28 }
 0x208   :  { %v268_v29 = vpop.f32.mrb[0].mxu1 }
 0x209   :  { %279 = vst [vmem:[#allocation8] sm:$0xff] %v268_v29  ;;  %v381_v30 = vpop.f32.mrb[1].mxu1 }
 0x20a   :  { %v271_v31 = vpop.f32.mrb[2].mxu1 }
 0x20b   :  { %280 = vst [vmem:[#allocation8 + $0x8] sm:$0xff] %v271_v31  ;;  %v382_v32 = vpop.f32.mrb[3].mxu1 }
 0x20c   :  { %486 = shalt.err (!%p483_p0)
}
 0x20d   :  { %s487_s27 = scalar_lea.hbm %s596_s3, 256 }
 0x20e   :  { %p488_p1 = scmp.ne.s32.totalorder %s596_s3, %s487_s27  ;;  %p491_p2 = scmp.lt.u32.totalorder %s487_s27, %s596_s3 }
 0x210   :  { %p493_p3 = pnand %p491_p2, %p488_p1 }
 0x212   :  { %496 = shalt.err (!%p493_p3)
}
 0x213   :  { %302 = dma.vmem_to_hbm [thread:$0]  %s297_s22, 256, %s596_s3, [#allocation4], %s507_s1, %s507_s1, %s508_s9  }
 0x214   :  { %501 = dma.done.wait [#allocation4], 256  }
 0x215   :  { %502 = vsyncadd [#allocation4], 4294967040 }
 0x216   :  { %306 = vsyncpa [#allocation3], 1 }
 0x217   :  { %307 = vsyncpa [#allocation6], 1 }
 0x218   :  { %308 = vsyncpa [#allocation4], 1 }

</bundles_post_ra>
